<compile_context>
chip_gen: v5e
topology: v5e:2x2
jax: 0.10.0
libtpu: 0.0.40
codegen_flags: <defaults>
</compile_context>

<pallas_src>
import functools

import jax
import jax.numpy as jnp
from jax.experimental import pallas as pl
from jax.experimental.pallas import tpu as pltpu


def _policy_kernel(x_ref, w1_ref, w2_ref, w3_ref, b_ref, out_ref, *, H, A):
    x = x_ref[...]

    # Bias rows: each read starts at lane 0 (sublane-indexed rows), no rotates.
    b1 = b_ref[0:1, : 2 * H]            # fused layer-1 bias  [1, 2H]
    b2 = b_ref[1:2, : 2 * H]            # fused layer-2 bias  [1, 2H]
    b3 = b_ref[2:3, : 2 * A + 1]        # fused layer-3 bias  [1, 2A+1]

    # Fused actor|critic layers (block-diagonal packed weights), ReLU on VPU.
    h = jnp.maximum(
        jnp.dot(x, w1_ref[...], preferred_element_type=jnp.float32) + b1, 0.0)
    h = jnp.maximum(
        jnp.dot(h, w2_ref[...], preferred_element_type=jnp.float32) + b2, 0.0)
    xo = jnp.dot(h, w3_ref[...], preferred_element_type=jnp.float32) + b3
    # xo columns: [ actor (mean preact) | actor (std preact) | critic value ]

    col = jax.lax.broadcasted_iota(jnp.int32, xo.shape, 1)

    mean = jnp.tanh(xo)
    # softplus matching torch's threshold=20 behavior; the clamp also keeps
    # exp finite on padded (out-of-range) tail rows, which are masked on store.
    e = jnp.exp(jnp.minimum(xo, 20.0))
    std = jnp.where(xo > 20.0, xo, jnp.log1p(e))

    # Pure VPU blend: cols [0,A) -> tanh, [A,2A) -> softplus, [2A] -> identity.
    out_ref[...] = jnp.where(col < A, mean, jnp.where(col < 2 * A, std, xo))


def _round_up(v, m):
    return ((v + m - 1) // m) * m


def policy_forward(x, packed, *, max_block_b=32768):
    """Run the Policy forward pass as a single Pallas TPU kernel.

    Args:
      x: [B, state_space] float32.
      packed: dict from `pack_params` (fused block-diagonal weights + packed bias).
    Returns:
      (mean, std, value): parameters of Normal(mean, std) and critic value [B, 1].
    """
    w1p, w2p, w3p, b_pack = packed["w1"], packed["w2"], packed["w3"], packed["b"]
    B, S = x.shape
    H = w1p.shape[1] // 2
    A = (w3p.shape[1] - 1) // 2
    out_w = 2 * A + 1

    weight_bytes = sum(int(a.size) * a.dtype.itemsize
                       for a in (w1p, w2p, w3p, b_pack))

    # ---- batch tiling -------------------------------------------------------
    # Small batches: one block.  Large batches: at least 2 blocks (multiple of 8)
    # so the parallel axis shards across both TensorCores on v7x, with a large
    # per-block cap since the kernel is grid-step-overhead bound.
    if B <= 1024:
        bb = B
    else:
        bb = min(max_block_b, _round_up(pl.cdiv(B, 2), 8))

    # VMEM budget: double-buffered x + out f32 tiles plus resident weights.
    # Stay well below v7x's 64 MiB physical VMEM (v5e/v6e have 128 MiB).
    def _tiles_bytes(b):
        return 2 * b * (S + out_w) * 4

    budget = 40 << 20
    while bb > 8 and _tiles_bytes(bb) + 2 * weight_bytes > budget:
        bb = max(8, _round_up(bb // 2, 8))

    nb = pl.cdiv(B, bb)
    vmem_limit = int(min(max(_tiles_bytes(bb) + 2 * weight_bytes + (4 << 20),
                             16 << 20), 100 << 20))

    kernel = functools.partial(_policy_kernel, H=H, A=A)

    out = pl.pallas_call(
        kernel,
        out_shape=jax.ShapeDtypeStruct((B, out_w), jnp.float32),
        grid=(nb,),
        in_specs=[
            pl.BlockSpec((bb, S), lambda i: (i, 0)),          # x: tiled over batch
            pl.BlockSpec(w1p.shape, lambda i: (0, 0)),        # weights resident
            pl.BlockSpec(w2p.shape, lambda i: (0, 0)),
            pl.BlockSpec(w3p.shape, lambda i: (0, 0)),
            pl.BlockSpec(b_pack.shape, lambda i: (0, 0)),     # row-packed biases
        ],
        out_specs=pl.BlockSpec((bb, out_w), lambda i: (i, 0)),
        compiler_params=pltpu.CompilerParams(
            dimension_semantics=("parallel",),
            vmem_limit_bytes=vmem_limit),
    )(x, w1p, w2p, w3p, b_pack)

    mean = out[:, :A]
    std = out[:, A: 2 * A]
    value = out[:, 2 * A:]
    return mean, std, value


def init_params(key, state_space, action_space, hidden_size=32):
    """Deterministic init matching torch: weight ~ N(0, 0.1), bias = 0.

    Weights are stored transposed relative to torch ([in, out] instead of
    [out, in]); biases are stored as [1, out].
    """
    ks = jax.random.split(key, 6)

    def w(k, fan_in, fan_out):
        return (0.1 * jax.random.normal(k, (fan_in, fan_out))).astype(jnp.float32)

    def b(fan_out):
        return jnp.zeros((1, fan_out), jnp.float32)

    return {
        "w1a": w(ks[0], state_space, hidden_size), "b1a": b(hidden_size),
        "w2a": w(ks[1], hidden_size, hidden_size), "b2a": b(hidden_size),
        "w3a": w(ks[2], hidden_size, action_space), "b3a": b(action_space),
        "w1c": w(ks[3], state_space, hidden_size), "b1c": b(hidden_size),
        "w2c": w(ks[4], hidden_size, hidden_size), "b2c": b(hidden_size),
        "w3c": w(ks[5], hidden_size, 1), "b3c": b(1),
    }


def pack_params(params):
    """Host-side one-time packing.

    * Block-diagonal fusion of actor/critic weights.
    * Layer-3 actor columns duplicated: xo = [mean-preact | std-preact | value].
    * Biases packed row-wise ([3, W]) so every kernel bias read starts at lane 0.
    """
    H = params["w1a"].shape[1]
    A = params["w3a"].shape[1]
    W = max(2 * H, 2 * A + 1)

    w1p = jnp.concatenate([params["w1a"], params["w1c"]], axis=1)        # [S, 2H]

    w2p = jnp.zeros((2 * H, 2 * H), jnp.float32)
    w2p = w2p.at[:H, :H].set(params["w2a"]).at[H:, H:].set(params["w2c"])

    w3p = jnp.zeros((2 * H, 2 * A + 1), jnp.float32)                     # [2H, 2A+1]
    w3p = w3p.at[:H, :A].set(params["w3a"])          # mean pre-activation
    w3p = w3p.at[:H, A:2 * A].set(params["w3a"])     # std pre-activation (duplicate)
    w3p = w3p.at[H:, 2 * A:].set(params["w3c"])      # critic value

    b_pack = jnp.zeros((3, W), jnp.float32)
    b_pack = b_pack.at[0, :2 * H].set(
        jnp.concatenate([params["b1a"][0], params["b1c"][0]]))
    b_pack = b_pack.at[1, :2 * H].set(
        jnp.concatenate([params["b2a"][0], params["b2c"][0]]))
    b_pack = b_pack.at[2, :2 * A + 1].set(
        jnp.concatenate([params["b3a"][0], params["b3a"][0], params["b3c"][0]]))

    return {"w1": w1p.astype(jnp.float32),
            "w2": w2p.astype(jnp.float32),
            "w3": w3p.astype(jnp.float32),
            "b": b_pack}


def _reference_forward(x, p):
    def lin(h, w, bb):
        return h @ w + bb
    a = jax.nn.relu(lin(x, p["w1a"], p["b1a"]))
    a = jax.nn.relu(lin(a, p["w2a"], p["b2a"]))
    xa = lin(a, p["w3a"], p["b3a"])
    c = jax.nn.relu(lin(x, p["w1c"], p["b1c"]))
    c = jax.nn.relu(lin(c, p["w2c"], p["b2c"]))
    xc = lin(c, p["w3c"], p["b3c"])
    return jnp.tanh(xa), jax.nn.softplus(xa), xc


if __name__ == "__main__":
    key = jax.random.PRNGKey(0)
    k_param, k_x = jax.random.split(key)

    batch = 2
    state_space = 8
    action_space = 4
    hidden_size = 32

    params = init_params(k_param, state_space, action_space, hidden_size)
    packed = pack_params(params)
    x = jax.random.normal(k_x, (batch, state_space), dtype=jnp.float32)

    mean, std, value = policy_forward(x, packed)
    jax.block_until_ready((mean, std, value))

    # Sanity check against a pure-JAX reference on the unpacked params.
    r_mean, r_std, r_val = _reference_forward(x, params)
    assert mean.shape == (batch, action_space)
    assert std.shape == (batch, action_space)
    assert value.shape == (batch, 1)
    assert jnp.allclose(mean, r_mean, atol=1e-5)
    assert jnp.allclose(std, r_std, atol=1e-5)
    assert jnp.allclose(value, r_val, atol=1e-5)

    print("KERNEL_OK")
</pallas_src>

<mosaic_0001>
module attributes {stable_mosaic.version = 11 : i64} {
  func.func @_policy_kernel(%arg0: i32, %arg1: memref<2x8xf32, #tpu.memory_space<vmem>>, %arg2: memref<8x64xf32, #tpu.memory_space<vmem>>, %arg3: memref<64x64xf32, #tpu.memory_space<vmem>>, %arg4: memref<64x9xf32, #tpu.memory_space<vmem>>, %arg5: memref<3x64xf32, #tpu.memory_space<vmem>>, %arg6: memref<2x9xf32, #tpu.memory_space<vmem>>) attributes {dimension_semantics = [#tpu.dimension_semantics<parallel>], iteration_bounds = array<i64: 1>, scalar_prefetch = 0 : i64, scratch_operands = 0 : i64, tpu.core_type = #tpu.core_type<tc>, window_params = [{transform_indices = @transform_0, window_bounds = array<i64: 2, 8>}, {pipeline_mode = #tpu.pipeline_mode<synchronous>, transform_indices = @transform_1, window_bounds = array<i64: 8, 64>}, {pipeline_mode = #tpu.pipeline_mode<synchronous>, transform_indices = @transform_2, window_bounds = array<i64: 64, 64>}, {pipeline_mode = #tpu.pipeline_mode<synchronous>, transform_indices = @transform_3, window_bounds = array<i64: 64, 9>}, {pipeline_mode = #tpu.pipeline_mode<synchronous>, transform_indices = @transform_4, window_bounds = array<i64: 3, 64>}, {transform_indices = @transform_5, window_bounds = array<i64: 2, 9>}]} {
    %c0 = arith.constant 0 : index
    %c0_0 = arith.constant 0 : index
    %0 = vector.load %arg1[%c0, %c0_0] : memref<2x8xf32, #tpu.memory_space<vmem>>, vector<2x8xf32>
    %c0_1 = arith.constant 0 : index
    %c0_2 = arith.constant 0 : index
    %1 = vector.load %arg5[%c0_1, %c0_2] : memref<3x64xf32, #tpu.memory_space<vmem>>, vector<1x64xf32>
    %c1 = arith.constant 1 : index
    %c0_3 = arith.constant 0 : index
    %2 = vector.load %arg5[%c1, %c0_3] : memref<3x64xf32, #tpu.memory_space<vmem>>, vector<1x64xf32>
    %c2 = arith.constant 2 : index
    %c0_4 = arith.constant 0 : index
    %3 = vector.load %arg5[%c2, %c0_4] : memref<3x64xf32, #tpu.memory_space<vmem>>, vector<1x9xf32>
    %c0_5 = arith.constant 0 : index
    %c0_6 = arith.constant 0 : index
    %4 = vector.load %arg2[%c0_5, %c0_6] : memref<8x64xf32, #tpu.memory_space<vmem>>, vector<8x64xf32>
    %cst = arith.constant dense<0.000000e+00> : vector<2x64xf32>
    %5 = tpu.matmul %0, %4, %cst {dimension_numbers = #tpu.dot_dimension_numbers<[1], [0], [0], [1], [0, 0, 1, 1], [], []>} : vector<2x8xf32>, vector<8x64xf32>, vector<2x64xf32> -> vector<2x64xf32>
    %6 = vector.broadcast %1 : vector<1x64xf32> to vector<2x64xf32>
    %7 = arith.addf %5, %6 : vector<2x64xf32>
    %cst_7 = arith.constant 0.000000e+00 : f32
    %8 = vector.broadcast %cst_7 : f32 to vector<2x64xf32>
    %9 = arith.maximumf %7, %8 : vector<2x64xf32>
    %c0_8 = arith.constant 0 : index
    %c0_9 = arith.constant 0 : index
    %10 = vector.load %arg3[%c0_8, %c0_9] : memref<64x64xf32, #tpu.memory_space<vmem>>, vector<64x64xf32>
    %cst_10 = arith.constant dense<0.000000e+00> : vector<2x64xf32>
    %11 = tpu.matmul %9, %10, %cst_10 {dimension_numbers = #tpu.dot_dimension_numbers<[1], [0], [0], [1], [0, 0, 1, 1], [], []>} : vector<2x64xf32>, vector<64x64xf32>, vector<2x64xf32> -> vector<2x64xf32>
    %12 = vector.broadcast %2 : vector<1x64xf32> to vector<2x64xf32>
    %13 = arith.addf %11, %12 : vector<2x64xf32>
    %cst_11 = arith.constant 0.000000e+00 : f32
    %14 = vector.broadcast %cst_11 : f32 to vector<2x64xf32>
    %15 = arith.maximumf %13, %14 : vector<2x64xf32>
    %c0_12 = arith.constant 0 : index
    %c0_13 = arith.constant 0 : index
    %16 = vector.load %arg4[%c0_12, %c0_13] : memref<64x9xf32, #tpu.memory_space<vmem>>, vector<64x9xf32>
    %cst_14 = arith.constant dense<0.000000e+00> : vector<2x9xf32>
    %17 = tpu.matmul %15, %16, %cst_14 {dimension_numbers = #tpu.dot_dimension_numbers<[1], [0], [0], [1], [0, 0, 1, 1], [], []>} : vector<2x64xf32>, vector<64x9xf32>, vector<2x9xf32> -> vector<2x9xf32>
    %18 = vector.broadcast %3 : vector<1x9xf32> to vector<2x9xf32>
    %19 = arith.addf %17, %18 : vector<2x9xf32>
    %20 = tpu.iota {dimensions = array<i32: 1>} : vector<2x9xi32>
    %21 = math.tanh %19 : vector<2x9xf32>
    %cst_15 = arith.constant 2.000000e+01 : f32
    %22 = vector.broadcast %cst_15 : f32 to vector<2x9xf32>
    %23 = arith.minimumf %19, %22 : vector<2x9xf32>
    %24 = math.exp %23 : vector<2x9xf32>
    %cst_16 = arith.constant 2.000000e+01 : f32
    %25 = vector.broadcast %cst_16 : f32 to vector<2x9xf32>
    %26 = arith.cmpf ogt, %19, %25 : vector<2x9xf32>
    %27 = math.log1p %24 : vector<2x9xf32>
    %28 = arith.select %26, %19, %27 : vector<2x9xi1>, vector<2x9xf32>
    %c4_i32 = arith.constant 4 : i32
    %29 = vector.broadcast %c4_i32 : i32 to vector<2x9xi32>
    %30 = arith.cmpi slt, %20, %29 : vector<2x9xi32>
    %c8_i32 = arith.constant 8 : i32
    %31 = vector.broadcast %c8_i32 : i32 to vector<2x9xi32>
    %32 = arith.cmpi slt, %20, %31 : vector<2x9xi32>
    %33 = arith.select %32, %28, %19 : vector<2x9xi1>, vector<2x9xf32>
    %34 = arith.select %30, %21, %33 : vector<2x9xi1>, vector<2x9xf32>
    %c0_17 = arith.constant 0 : index
    %c0_18 = arith.constant 0 : index
    %35 = vector.load %arg6[%c0_17, %c0_18] : memref<2x9xf32, #tpu.memory_space<vmem>>, vector<2x9xf32>
    tpu.vector_store %arg6[%c0_17, %c0_18], %34 {strides = array<i32>} : memref<2x9xf32, #tpu.memory_space<vmem>>, vector<2x9xf32>,
    return
  }
  func.func @transform_0(%arg0: i32) -> (i32, i32) {
    %c0_i32 = arith.constant 0 : i32
    %c0_i32_0 = arith.constant 0 : i32
    return %arg0, %c0_i32 : i32, i32
  }
  func.func @transform_1(%arg0: i32) -> (i32, i32) {
    %c0_i32 = arith.constant 0 : i32
    %c0_i32_0 = arith.constant 0 : i32
    %c0_i32_1 = arith.constant 0 : i32
    return %c0_i32, %c0_i32_0 : i32, i32
  }
  func.func @transform_2(%arg0: i32) -> (i32, i32) {
    %c0_i32 = arith.constant 0 : i32
    %c0_i32_0 = arith.constant 0 : i32
    %c0_i32_1 = arith.constant 0 : i32
    return %c0_i32, %c0_i32_0 : i32, i32
  }
  func.func @transform_3(%arg0: i32) -> (i32, i32) {
    %c0_i32 = arith.constant 0 : i32
    %c0_i32_0 = arith.constant 0 : i32
    %c0_i32_1 = arith.constant 0 : i32
    return %c0_i32, %c0_i32_0 : i32, i32
  }
  func.func @transform_4(%arg0: i32) -> (i32, i32) {
    %c0_i32 = arith.constant 0 : i32
    %c0_i32_0 = arith.constant 0 : i32
    %c0_i32_1 = arith.constant 0 : i32
    return %c0_i32, %c0_i32_0 : i32, i32
  }
  func.func @transform_5(%arg0: i32) -> (i32, i32) {
    %c0_i32 = arith.constant 0 : i32
    %c0_i32_0 = arith.constant 0 : i32
    return %arg0, %c0_i32 : i32, i32
  }
}

</mosaic_0001>

<bundles_post_ra>
// kernel: tpu_custom_call.1
= control target key start
LH: loop header
LB: loop body
LE: loop exit
PB: predicated region body
PF: predicated region fallthrough
CT: control target
= control target key end

     0   :  { %vm27_vm0 = vcmask 64512   ;;  %s293_s0 = inlined_call_operand.vmem [shape: f32[2,8], index: 0, kind: input, shape index: {}]   ;;  %s294_s1 = inlined_call_operand.vmem [shape: f32[8,64], index: 1, kind: input, shape index: {}]   ;;  %s295_s2 = inlined_call_operand.vmem [shape: f32[64,64], index: 2, kind: input, shape index: {}]   ;;  %s296_s3 = inlined_call_operand.vmem [shape: f32[64,9], index: 3, kind: input, shape index: {}]   ;;  %s297_s4 = inlined_call_operand.vmem [shape: f32[3,64], index: 4, kind: input, shape index: {}]   ;;  %s298_s5 = inlined_call_operand.hbm [shape: f32[2,9], index: 5, kind: output, shape index: {}]  }
   0x1   :  { %v25_v0 = vld [vmem:[%s294_s1] sm:$0xff]  ;;  %v59_v2 = vld [vmem:[%s295_s2 + $0x38] sm:$0xff]  ;;  %v58_v3 = vld [vmem:[%s295_s2 + $0x30] sm:$0xff] }
   0x2   :  { %v21_v1 = vld [vmem:[%s293_s0] sm:$0x3]  ;;  %46 = vmatpush.msra.mxu0 %v25_v0  ;;  %73 = vmatpush.msra.mxu1 %v59_v2  ;;  %v57_v4 = vld [vmem:[%s295_s2 + $0x28] sm:$0xff] }
   0x3   :  { %157 = vmatmul.msk.f32.vlgmr.msra.gmra.mxu0 %vm27_vm0, %v21_v1 }
   0x4   :  { %74 = vmatpush.msra.mxu1 %v58_v3 }
   0x5   :  { %10 = vsyncpa [#allocation3], 0  ;;  %v56_v5 = vld [vmem:[%s295_s2 + $0x20] sm:$0xff]  ;;  %v55_v6 = vld [vmem:[%s295_s2 + $0x18] sm:$0xff]  ;;  %vm61_vm1 = vcmask 523264   ;;  %v118_v34 = vlaneseq  ;;  %s148_s7 = sshll.u32 %s298_s5, 4  ;;  %s149_s7 = int_to_ptr.hbm [resolvable:$true] %s148_s7 }
   0x6   :  { %75 = vmatpush.msra.mxu1 %v57_v4  ;;  %v54_v7 = vld [vmem:[%s295_s2 + $0x10] sm:$0xff]  ;;  %v53_v8 = vld [vmem:[%s295_s2 + $0x8] sm:$0xff]  ;;  %v52_v9 = vld [vmem:[%s295_s2] sm:$0xff]  ;;  %vm139_vm6 = vcmask 66560  }
   0x7   :  { %v93_v10 = vld [vmem:[%s296_s3 + $0x38] sm:$0xff]  ;;  %v92_v11 = vld [vmem:[%s296_s3 + $0x30] sm:$0xff]  ;;  %v91_v12 = vld [vmem:[%s296_s3 + $0x28] sm:$0xff]  ;;  %v119_v36 = vand.u32 127, %v118_v34 }
   0x8   :  { %76 = vmatpush.msra.mxu1 %v56_v5  ;;  %106 = vmatpush.msra.mxu2 %v93_v10  ;;  %v90_v13 = vld [vmem:[%s296_s3 + $0x20] sm:$0xff]  ;;  %v89_v14 = vld [vmem:[%s296_s3 + $0x18] sm:$0xff]  ;;  %v88_v19 = vld [vmem:[%s296_s3 + $0x10] sm:$0xff] }
   0x9   :  { %v161_v15 = vld [vmem:[%s297_s4] ss:$0 sm:$0xff]  ;;  %v87_v20 = vld [vmem:[%s296_s3 + $0x8] sm:$0xff]  ;;  %v162_v22 = vld [vmem:[%s297_s4 + $0x1] ss:$0 sm:$0xff]  ;;  %vm136_vm3 = vcmp.lt.s32.totalorder %v119_v36, 8 }
   0xa   :  { %77 = vmatpush.msra.mxu1 %v55_v6  ;;  %107 = vmatpush.msra.mxu2 %v92_v11  ;;  %v86_v21 = vld [vmem:[%s296_s3] sm:$0xff]  ;;  %s196_s3 = smov [#allocation2]   ;;  %vm135_vm5 = vcmp.lt.s32.totalorder %v119_v36, 4 }
   0xb   :  { %v163_v26 = vld [vmem:[%s297_s4 + $0x2] ss:$0 sm:$0xff]  ;;  %s146_s4 = sshll.u32 %s196_s3, 4  ;;  %s147_s4 = int_to_ptr.vmem [resolvable:$true] %s146_s4 }
   0xc   :  { %78 = vmatpush.msra.mxu1 %v54_v7  ;;  %108 = vmatpush.msra.mxu2 %v91_v12 }
   0xe   :  { %79 = vmatpush.msra.mxu1 %v53_v8  ;;  %109 = vmatpush.msra.mxu2 %v90_v13 }
  0x10   :  { %80 = vmatpush.msra.mxu1 %v52_v9  ;;  %110 = vmatpush.msra.mxu2 %v89_v14 }
  0x12   :  { %111 = vmatpush.msra.mxu2 %v88_v19 }
  0x14   :  { %112 = vmatpush.msra.mxu2 %v87_v20 }
  0x16   :  { %113 = vmatpush.msra.mxu2 %v86_v21 }
  0x80   :  { %v48_v16 = vpop.f32.mrf.mxu0 }
  0x81   :  { %v49_v17 = vadd.f32 %v161_v15, %v48_v16 }
  0x83   :  { %v51_v18 = vmax.f32 %v49_v17, 0.0 }
  0x85   :  { %158 = vmatmul.msk.f32.vlgmr.msra.gmra.mxu1 %vm61_vm1, %v51_v18 }
 0x102   :  { %v82_v23 = vpop.f32.mrf.mxu1 }
 0x103   :  { %v83_v24 = vadd.f32 %v162_v22, %v82_v23 }
 0x105   :  { %v85_v25 = vmax.f32 %v83_v24, 0.0 }
 0x107   :  { %159 = vmatmul.msk.f32.vlgmr.msra.gmra.mxu2 %vm61_vm1, %v85_v25 }
 0x18a   :  { %v115_v27 = vpop.f32.mrf.mxu2 }
 0x18b   :  { %v116_v28 = vadd.f32 %v163_v26, %v115_v27 }
 0x18d   :  { %v121_v29 = vmin.f32 %v116_v28, 20.0  ;;  %vm124_vm4 = vcmp.gt.f32.partialorder %v116_v28, 20.0 }
 0x18f   :  { %v122_v30 = vmul.f32 1.442695, %v121_v29 }
 0x191   :  { %164 = vpow2.f32 %v122_v30 }
 0x197   :  { %v165_v31 = vpop.eup %164 }
 0x198   :  { %v125_v32 = vadd.f32 1.0, %v165_v31  ;;  %v128_v33 = vmul.f32 -0.5, %v165_v31  ;;  %v131_v37 = vand.u32 2147483647, %v165_v31 }
 0x19a   :  { %166 = vlog2.f32 %v125_v32  ;;  %v129_v35 = vadd.f32 1.0, %v128_v33  ;;  %vm132_vm2 = vcmp.lt.f32.partialorder %v131_v37, 0.0004427343 }
 0x19b   :  { %168 = vtanh.f32 %v116_v28 }
 0x19c   :  { %v130_v40 = vmul.f32 %v165_v31, %v129_v35 }
 0x1a0   :  { %v167_v38 = vpop.eup %166 }
 0x1a1   :  { %v127_v39 = vmul.f32 0.6931472, %v167_v38  ;;  %v169_v43 = vpop.eup %168 }
 0x1a3   :  { %v133_v41 = vsel %vm132_vm2, %v130_v40, %v127_v39 }
 0x1a4   :  { %v134_v42 = vsel %vm124_vm4, %v116_v28, %v133_v41 }
 0x1a5   :  { %v137_v44 = vsel %vm136_vm3, %v134_v42, %v116_v28 }
 0x1a6   :  { %v138_v45 = vsel %vm135_vm5, %v169_v43, %v137_v44 }
 0x1a7   :  { %140 = vst.msk [vmem:[#allocation2] sm:$0x3] %vm139_vm6, %v138_v45 }
 0x1a8   :  { %151 = dma.vmem_to_hbm [thread:$0]  %s147_s4, 32, %s149_s7, [#allocation3]  }
 0x1a9   :  { %194 = dma.done.wait [#allocation3], 32  }
 0x1aa   :  { %195 = vsyncadd [#allocation3], 4294967264 }
 0x1ab   :  { %156 = vsyncpa [#allocation3], 1 }

</bundles_post_ra>
